<compile_context>
chip_gen: v7x
topology: tpu7x:2x2x1
jax: 0.10.0
libtpu: 0.0.40
codegen_flags: <defaults>
</compile_context>

<pallas_src>
import functools
import math

import jax
import jax.numpy as jnp
from jax.experimental import pallas as pl
from jax.experimental.pallas import tpu as pltpu


def _round_up(x, m):
    return ((x + m - 1) // m) * m


def _cdiv(a, b):
    return -(-a // b)


@functools.lru_cache(maxsize=None)
def _vmem_limit_bytes():
    """Scoped-VMEM limit: ~3/4 of physical VMEM (96 MiB on v5e/v6e which have
    128 MiB, 48 MiB on v7x which has 64 MiB), capped at 96 MiB."""
    phys = 64 * 1024 * 1024  # conservative fallback = v7x physical VMEM
    try:
        phys = int(pltpu.get_tpu_info().vmem_capacity_bytes)
    except Exception:
        pass
    return int(min(phys * 3 // 4, 96 * 1024 * 1024))


def gwl_kernel(x_ref, w_ref, b_ref, o_ref, *, bc):
    # x_ref: (tb, tc, D)  -- tb batch rows, tc classes per grid step
    # w_ref: (tc, D)      -- grid-invariant along the batch axis, single-buffered
    # b_ref: (1, tc)
    # o_ref: (tb, tc)
    w = w_ref[...].astype(jnp.float32)        # upcast ONCE per grid step
    bias = b_ref[...].astype(jnp.float32)     # (1, tc)
    tb = x_ref.shape[0]
    # Chunk over batch rows: bounds the live f32 temporaries (upcast x chunk +
    # broadcast product) to ~<=2 MiB instead of full-tile f32 copies, which
    # kills vreg/VMEM spill traffic and frees budget for a larger x tile.
    for b0 in range(0, tb, bc):
        bl = min(bc, tb - b0)
        xc = x_ref[pl.ds(b0, bl)].astype(jnp.float32)   # (bl, tc, D) f32
        s = jnp.sum(xc * w, axis=-1) + bias             # (bl, tc), f32 accumulate
        o_ref[pl.ds(b0, bl)] = s.astype(o_ref.dtype)


def _choose_tiles(B, C, D, x_itemsize, w_itemsize, out_itemsize, vmem_limit):
    """Pick (tb, bc, tc, b_blocks, c_blocks) from the VMEM budget."""
    row_x = C * D * x_itemsize        # one batch row of x in its input dtype
    row_f32 = C * D * 4               # one batch row upcast to f32

    # Resident (non-tb-scaled) VMEM: W single buffer (in W's dtype), its f32
    # upcast if W is not already f32, bias, plus a flat reservation for the
    # in-kernel chunk temporaries.
    resident = C * D * w_itemsize
    if w_itemsize != 4:
        resident += C * D * 4
    resident += 6 * 1024 * 1024
    resident += 8 * C * 4

    budget = int(vmem_limit * 0.85)                 # headroom for compiler scratch
    per_tb = 2 * row_x + 2 * C * out_itemsize       # double-buffered x + out per row
    tb = max((budget - resident) // per_tb, 1)
    # ~8 MiB per x buffer already hits >=85-90% of the HBM roofline on every
    # generation; bigger tiles only add VMEM pressure.
    tb = min(tb, max((8 * 1024 * 1024) // max(row_x, 1), 1))
    tb = min(tb, B)
    if tb < B:
        # (8,128) rule: the out block's second-to-last dim (tb) must be a
        # multiple of 8 unless it equals the full batch extent.
        tb = min(max(8, tb - tb % 8), B)

    # In-kernel batch chunk: <=~2 MiB of f32 per chunk, at most ~16 chunks.
    bc = max(1, min(tb, (2 * 1024 * 1024) // max(row_f32, 1)))
    bc = max(bc, _cdiv(tb, 16))
    if 8 <= bc < tb:
        bc -= bc % 8                                # sublane-aligned partial stores

    # Second grid axis over C only when the batch collapses to one step, so a
    # v7x chip (2 TensorCores) still gets >=2 parallel steps.
    b_blocks = _cdiv(B, tb)
    tc, c_blocks = C, 1
    if b_blocks == 1 and C >= 256:
        tc = max(128, _round_up(_cdiv(C, 4), 128))
        c_blocks = _cdiv(C, tc)
    return tb, bc, tc, b_blocks, c_blocks


@jax.jit
def groupwise_linear(x, W, b):
    """x: (B, C, D), W: (C, D), b: (1, C) -> (B, C). f32 or bf16 inputs."""
    B, C, D = x.shape
    assert W.shape == (C, D)
    assert b.shape == (1, C)

    vmem_limit = _vmem_limit_bytes()
    tb, bc, tc, b_blocks, c_blocks = _choose_tiles(
        B, C, D, x.dtype.itemsize, W.dtype.itemsize, x.dtype.itemsize, vmem_limit)

    x_spec = pl.BlockSpec((tb, tc, D), lambda i, j: (i, j, 0))
    out_spec = pl.BlockSpec((tb, tc), lambda i, j: (i, j))
    if c_blocks == 1:
        # Grid-invariant weights/bias: constant block index + a single VMEM
        # buffer (no dead second copy from the default double-buffering).
        w_spec = pl.BlockSpec((tc, D), lambda i, j: (0, 0),
                              pipeline_mode=pl.Buffered(1))
        b_spec = pl.BlockSpec((1, tc), lambda i, j: (0, 0),
                              pipeline_mode=pl.Buffered(1))
    else:
        w_spec = pl.BlockSpec((tc, D), lambda i, j: (j, 0))
        b_spec = pl.BlockSpec((1, tc), lambda i, j: (0, j))

    # TODO(synk): for weights too large to stay VMEM-resident (huge C*D) add a
    # reduction grid axis over D with an f32 accumulator; not needed at
    # GroupWiseLinear-typical sizes.
    return pl.pallas_call(
        functools.partial(gwl_kernel, bc=bc),
        out_shape=jax.ShapeDtypeStruct((B, C), x.dtype),
        grid_spec=pltpu.PrefetchScalarGridSpec(
            num_scalar_prefetch=0,
            grid=(b_blocks, c_blocks),
            in_specs=[x_spec, w_spec, b_spec],
            out_specs=out_spec,
        ),
        compiler_params=pltpu.CompilerParams(
            dimension_semantics=("parallel", "parallel"),
            vmem_limit_bytes=vmem_limit,
        ),
    )(x, W, b)


def init_params(key, num_class, hidden_dim):
    """Deterministic init matching reset_parameters(): U(-stdv, stdv), stdv = 1/sqrt(hidden_dim)."""
    stdv = 1.0 / math.sqrt(hidden_dim)
    kw, kb = jax.random.split(key)
    W = jax.random.uniform(kw, (num_class, hidden_dim), jnp.float32,
                           minval=-stdv, maxval=stdv)
    b = jax.random.uniform(kb, (1, num_class), jnp.float32,
                           minval=-stdv, maxval=stdv)
    return W, b


if __name__ == "__main__":
    key = jax.random.PRNGKey(0)
    kx, kp = jax.random.split(key)

    B, num_class, hidden_dim = 2, 4, 32
    x = jax.random.normal(kx, (B, num_class, hidden_dim), jnp.float32)
    W, b = init_params(kp, num_class, hidden_dim)

    out = jax.block_until_ready(groupwise_linear(x, W, b))

    # reference check (plain JAX mirror of the PyTorch forward)
    ref = jnp.sum(W[None, :, :] * x, axis=-1) + b
    assert out.shape == (B, num_class)
    assert jnp.allclose(out, ref, atol=1e-5, rtol=1e-5)

    print("KERNEL_OK")
</pallas_src>

<mosaic_0001>
module attributes {stable_mosaic.version = 11 : i64} {
  func.func @gwl_kernel(%arg0: i32, %arg1: i32, %arg2: memref<2x4x32xf32, #tpu.memory_space<vmem>>, %arg3: memref<4x32xf32, #tpu.memory_space<vmem>>, %arg4: memref<1x4xf32, #tpu.memory_space<vmem>>, %arg5: memref<2x4xf32, #tpu.memory_space<vmem>>) attributes {dimension_semantics = [#tpu.dimension_semantics<parallel>, #tpu.dimension_semantics<parallel>], iteration_bounds = array<i64: 1, 1>, scalar_prefetch = 0 : i64, scratch_operands = 0 : i64, tpu.core_type = #tpu.core_type<tc>, window_params = [{transform_indices = @transform_0, window_bounds = array<i64: 2, 4, 32>}, {pipeline_mode = #tpu.pipeline_mode<synchronous>, transform_indices = @transform_1, window_bounds = array<i64: 4, 32>}, {pipeline_mode = #tpu.pipeline_mode<synchronous>, transform_indices = @transform_2, window_bounds = array<i64: 1, 4>}, {transform_indices = @transform_3, window_bounds = array<i64: 2, 4>}]} {
    %c0 = arith.constant 0 : index
    %c0_0 = arith.constant 0 : index
    %0 = vector.load %arg3[%c0, %c0_0] : memref<4x32xf32, #tpu.memory_space<vmem>>, vector<4x32xf32>
    %c0_1 = arith.constant 0 : index
    %c0_2 = arith.constant 0 : index
    %1 = vector.load %arg4[%c0_1, %c0_2] : memref<1x4xf32, #tpu.memory_space<vmem>>, vector<1x4xf32>
    %c0_3 = arith.constant 0 : index
    %c0_4 = arith.constant 0 : index
    %c0_5 = arith.constant 0 : index
    %2 = vector.load %arg2[%c0_3, %c0_4, %c0_5] : memref<2x4x32xf32, #tpu.memory_space<vmem>>, vector<2x4x32xf32>
    %3 = vector.shape_cast %0 : vector<4x32xf32> to vector<1x4x32xf32>
    %4 = vector.broadcast %3 : vector<1x4x32xf32> to vector<2x4x32xf32>
    %5 = arith.mulf %2, %4 : vector<2x4x32xf32>
    %cst = arith.constant dense<0.000000e+00> : vector<2x4xf32>
    %6 = vector.multi_reduction <add>, %5, %cst [2] : vector<2x4x32xf32> to vector<2x4xf32>
    %7 = vector.broadcast %1 : vector<1x4xf32> to vector<2x4xf32>
    %8 = arith.addf %6, %7 : vector<2x4xf32>
    %c0_6 = arith.constant 0 : index
    %c0_7 = arith.constant 0 : index
    %9 = vector.load %arg5[%c0_6, %c0_7] : memref<2x4xf32, #tpu.memory_space<vmem>>, vector<2x4xf32>
    tpu.vector_store %arg5[%c0_6, %c0_7], %8 {strides = array<i32>} : memref<2x4xf32, #tpu.memory_space<vmem>>, vector<2x4xf32>,
    return
  }
  func.func @transform_0(%arg0: i32, %arg1: i32) -> (i32, i32, i32) {
    %c0_i32 = arith.constant 0 : i32
    %c0_i32_0 = arith.constant 0 : i32
    return %arg0, %arg1, %c0_i32 : i32, i32, i32
  }
  func.func @transform_1(%arg0: i32, %arg1: i32) -> (i32, i32) {
    %c0_i32 = arith.constant 0 : i32
    %c0_i32_0 = arith.constant 0 : i32
    %c0_i32_1 = arith.constant 0 : i32
    return %c0_i32, %c0_i32_0 : i32, i32
  }
  func.func @transform_2(%arg0: i32, %arg1: i32) -> (i32, i32) {
    %c0_i32 = arith.constant 0 : i32
    %c0_i32_0 = arith.constant 0 : i32
    %c0_i32_1 = arith.constant 0 : i32
    return %c0_i32, %c0_i32_0 : i32, i32
  }
  func.func @transform_3(%arg0: i32, %arg1: i32) -> (i32, i32) {
    %c0_i32 = arith.constant 0 : i32
    return %arg0, %arg1 : i32, i32
  }
}

</mosaic_0001>

<bundles_post_ra>
// kernel: groupwise_linear.1
= control target key start
LH: loop header
LB: loop body
LE: loop exit
PB: predicated region body
PF: predicated region fallthrough
CT: control target
= control target key end

     0   :  { %8 = vsyncpa [#allocation3], 0  ;;  %s250_s0 = inlined_call_operand.hbm [shape: f32[2,4,32], index: 0, kind: input, shape index: {}]   ;;  %s251_s1 = inlined_call_operand.hbm [shape: f32[4,32], index: 1, kind: input, shape index: {}]   ;;  %s252_s2 = inlined_call_operand.vmem [shape: f32[1,4], index: 2, kind: input, shape index: {}]   ;;  %s253_s3 = inlined_call_operand.hbm [shape: f32[2,4], index: 3, kind: output, shape index: {}]  }
   0x1   :  { %9 = vsyncpa [#allocation6], 0 }
   0x2   :  { %10 = vsyncpa [#allocation4], 0  ;;  %s185_s12 = smov [#allocation2]   ;;  %s113_s16 = scalar_lea.hbm %s250_s0, 128 }
   0x3   :  { %s16_s13 = sshll.u32 %s185_s12, 4  ;;  %p114_p0 = scmp.ne.s32.totalorder %s250_s0, %s113_s16  ;;  %s17_s13 = int_to_ptr.vmem [resolvable:$true] %s16_s13 }
   0x4   :  { %p117_p1 = scmp.lt.u32.totalorder %s113_s16, %s250_s0 }
   0x6   :  { %p119_p2 = pnand %p117_p1, %p114_p0 }
   0x8   :  { %122 = shalt.err (!%p119_p2)
}
   0x9   :  { %s123_s21 = scalar_lea.vmem %s17_s13, 128  ;;  %p128_p4 = scmp.lt.s32.totalorder %s17_s13, %s17_s13 }
   0xa   :  { %p124_p3 = scmp.ne.s32.totalorder %s17_s13, %s123_s21  ;;  %p129_p5 = scmp.lt.s32.totalorder %s123_s21, %s123_s21 }
   0xc   :  { %p130_p6 = por %p129_p5, %p128_p4 }
   0xe   :  { %p131_p7 = pnand %p130_p6, %p124_p3 }
  0x10   :  { %134 = shalt.err (!%p131_p7)
}
  0x11   :  { %s186_s22 = smov 64   ;;  %s187_s23 = smov 4  }
  0x12   :  { %22 = dma.hbm_to_vmem [thread:$0]  %s250_s0, 128, %s17_s13, [#allocation3], %s186_s22, %s186_s22, %s187_s23  }
  0x13   :  { %s188_s26 = smov [#allocation5]   ;;  %s135_s30 = scalar_lea.hbm %s251_s1, 64 }
  0x14   :  { %s29_s27 = sshll.u32 %s188_s26, 4  ;;  %p136_p8 = scmp.ne.s32.totalorder %s251_s1, %s135_s30  ;;  %s30_s27 = int_to_ptr.vmem [resolvable:$true] %s29_s27 }
  0x15   :  { %p139_p9 = scmp.lt.u32.totalorder %s135_s30, %s251_s1 }
  0x17   :  { %p141_p10 = pnand %p139_p9, %p136_p8 }
  0x19   :  { %144 = shalt.err (!%p141_p10)
}
  0x1a   :  { %s145_s8 = scalar_lea.vmem %s30_s27, 64  ;;  %p150_p12 = scmp.lt.s32.totalorder %s30_s27, %s30_s27 }
  0x1b   :  { %p146_p11 = scmp.ne.s32.totalorder %s30_s27, %s145_s8  ;;  %p151_p13 = scmp.lt.s32.totalorder %s145_s8, %s145_s8 }
  0x1d   :  { %p152_p0 = por %p151_p13, %p150_p12 }
  0x1f   :  { %p153_p1 = pnand %p152_p0, %p146_p11 }
  0x21   :  { %156 = shalt.err (!%p153_p1)
}
  0x22   :  { %32 = dma.hbm_to_vmem [thread:$0]  %s251_s1, 64, %s30_s27, [#allocation6]  }
  0x23   :  { %179 = dma.done.wait [#allocation3], 128  }
  0x24   :  { %180 = vsyncadd [#allocation3], 4294967168 }
  0x25   :  { %181 = dma.done.wait [#allocation6], 64  }
  0x26   :  { %182 = vsyncadd [#allocation6], 4294967232  ;;  %vm47_vm0 = vcmask 257024   ;;  %v41_v0 = vld [vmem:[#allocation5] sm:$0xf]  ;;  %v189_v8 = vmov 0   ;;  %v73_v14 = vlaneseq }
  0x27   :  { %v43_v1 = vld [vmem:[#allocation2] sm:$0xf]  ;;  %v44_v2 = vld [vmem:[#allocation2 + $0x4] sm:$0xf]  ;;  %111 = vset.pattern.permute.xlu1 %v189_v8  ;;  %112 = vset.pattern.permute.xlu0 %v189_v8  ;;  %s190_s1 = smov [#allocation7]   ;;  %vm83_vm1 = vcmask 1041409  }
  0x28   :  { %v45_v3 = vmul.f32 %v43_v1, %v41_v0  ;;  %v46_v4 = vmul.f32 %v44_v2, %v41_v0  ;;  %v104_v5 = vld [vmem:[%s252_s2] ss:$0 sm:$0xff]  ;;  %v74_v15 = vand.u32 127, %v73_v14  ;;  %v76_v16 = vshrl.u32 %v73_v14, 7  ;;  %s94_s2 = sshll.u32 %s190_s1, 4  ;;  %s95_s2 = int_to_ptr.vmem [resolvable:$true] %s94_s2 }
  0x29   :  { %60 = vbcast.lane.b32.xlu1 %v104_v5, 256  ;;  %vm86_vm2 = vcmask 25600   ;;  %s157_s12 = scalar_lea.vmem %s95_s2, 32  ;;  %p162_p3 = scmp.lt.s32.totalorder %s95_s2, %s95_s2 }
  0x2a   :  { %v48_v6 = vsel %vm47_vm0, %v45_v3, 0.0  ;;  %v51_v7 = vsel %vm47_vm0, %v46_v4, 0.0  ;;  %v77_v17 = vsub.s32 %v74_v15, %v76_v16  ;;  %p158_p2 = scmp.ne.s32.totalorder %s95_s2, %s157_s12  ;;  %p163_p4 = scmp.lt.s32.totalorder %s157_s12, %s157_s12 }
  0x2b   :  { %49 = vadd.xlane.f32.xlu0 %v48_v6 }
  0x2c   :  { %p164_p5 = por %p163_p4, %p162_p3 }
  0x2e   :  { %p165_p6 = pnand %p164_p5, %p158_p2 }
  0x2f   :  { %52 = vadd.xlane.f32.xlu0 %v51_v7 }
  0x9b   :  { %v61_v9 = vpop.permute.xlu1 %60 }
  0xb8   :  { %v50_v10 = vpop.xlane.xlu0 %49 }
  0xb9   :  { %v63_v11 = vadd.f32 %v61_v9, %v50_v10 }
  0xbb   :  { %68 = vperm.xlu1 %111, %v63_v11  }
  0xbc   :  { %v53_v12 = vpop.xlane.xlu0 %52 }
  0xbd   :  { %v64_v13 = vadd.f32 %v61_v9, %v53_v12 }
  0xbf   :  { %71 = vperm.xlu0 %112, %v64_v13  }
 0x13a   :  { %v69_v18 = vpop.permute.xlu1 %68 }
 0x13b   :  { %v78_v20 = vrot.slane %v69_v18, %v77_v17 }
 0x13e   :  { %v72_v19 = vpop.permute.xlu0 %71 }
 0x13f   :  { %v82_v21 = vrot.slane %v72_v19, %v77_v17 }
 0x141   :  { %v84_v22 = vsel %vm83_vm1, %v82_v21, %v78_v20 }
 0x142   :  { %87 = vst.msk [vmem:[#allocation7] sm:$0x3] %vm86_vm2, %v84_v22 }
 0x143   :  { %168 = shalt.err (!%p165_p6)
}
 0x144   :  { %s169_s15 = scalar_lea.hbm %s253_s3, 32 }
 0x145   :  { %p170_p7 = scmp.ne.s32.totalorder %s253_s3, %s169_s15  ;;  %p173_p8 = scmp.lt.u32.totalorder %s169_s15, %s253_s3 }
 0x147   :  { %p175_p9 = pnand %p173_p8, %p170_p7 }
 0x149   :  { %178 = shalt.err (!%p175_p9)
}
 0x14a   :  { %97 = dma.vmem_to_hbm [thread:$0]  %s95_s2, 32, %s253_s3, [#allocation4]  }
 0x14b   :  { %183 = dma.done.wait [#allocation4], 32  }
 0x14c   :  { %184 = vsyncadd [#allocation4], 4294967264 }
 0x14d   :  { %101 = vsyncpa [#allocation3], 1 }
 0x14e   :  { %102 = vsyncpa [#allocation6], 1 }
 0x14f   :  { %103 = vsyncpa [#allocation4], 1 }

</bundles_post_ra>
